<compile_context>
chip_gen: v6e
topology: v6e:2x2x1
jax: 0.10.0
libtpu: 0.0.40
codegen_flags: <defaults>
</compile_context>

<pallas_src>
import functools

import jax
import jax.numpy as jnp
from jax.experimental import pallas as pl
from jax.experimental.pallas import tpu as pltpu


def _cosine_head_kernel(rows1_ref, rows2_ref, feat_hbm, o_ref,
                        xbuf, ybuf, sem, *, tile_b: int, eps: float):
    """One grid step = one batch tile of `tile_b` examples.

    rows1_ref, rows2_ref : SMEM int32 [B_pad]   flat row indices into feat_hbm
    feat_hbm             : HBM  [B*S, D]        full hidden states (no auto-DMA)
    o_ref                : VMEM [1, tile_b]     lane-dense cosine similarities
    xbuf, ybuf           : VMEM [tile_b, D]     gathered cls1 / cls2 rows
    sem                  : DMA semaphores, shape (2,)
    """
    base = pl.program_id(0) * tile_b

    # Issue all row-gather DMAs for this tile, then wait for all of them.
    # All copies on one semaphore are the same size, so start-all / wait-all
    # is valid regardless of completion order.
    # TODO(synk): cross-tile prefetch (start tile i+1's gathers while computing
    # tile i) would hide gather latency further; omitted for simplicity.
    @pl.loop(0, tile_b)
    def _start(r):
        pltpu.make_async_copy(feat_hbm.at[rows1_ref[base + r]], xbuf.at[r],
                              sem.at[0]).start()
        pltpu.make_async_copy(feat_hbm.at[rows2_ref[base + r]], ybuf.at[r],
                              sem.at[1]).start()

    @pl.loop(0, tile_b)
    def _wait(r):
        pltpu.make_async_copy(feat_hbm.at[rows1_ref[base + r]], xbuf.at[r],
                              sem.at[0]).wait()
        pltpu.make_async_copy(feat_hbm.at[rows2_ref[base + r]], ybuf.at[r],
                              sem.at[1]).wait()

    x = xbuf[...].astype(jnp.float32)                   # [tile_b, D]
    y = ybuf[...].astype(jnp.float32)

    dot = jnp.sum(x * y, axis=-1, keepdims=True)        # [tile_b, 1]
    nx2 = jnp.sum(x * x, axis=-1, keepdims=True)
    ny2 = jnp.sum(y * y, axis=-1, keepdims=True)

    # torch.nn.CosineSimilarity: dot / max(|x|*|y|, eps)
    #   == dot * rsqrt(max(|x|^2 * |y|^2, eps^2))   (single EUP op per row)
    inv = jax.lax.rsqrt(jnp.maximum(nx2 * ny2, jnp.float32(eps * eps)))
    cos = dot * inv                                      # [tile_b, 1]

    # Lane-dense store of the whole tile at once.
    o_ref[...] = jnp.reshape(cos, (1, tile_b)).astype(o_ref.dtype)


def two_sentence_regression_head(feature, second_cls_idx, *, cos_eps=1e-8,
                                 tile_b=128):
    """feature: [B, S, D]; second_cls_idx: int32 [2, B] = (batch idx, seq idx)."""
    B, S, D = feature.shape
    feat_flat = feature.reshape(B * S, D)                # contiguous -> free reshape

    # Flat row indices of the two CLS tokens for every example.
    rows1 = jnp.arange(B, dtype=jnp.int32) * S                               # feature[:, 0, :]
    rows2 = (second_cls_idx[0].astype(jnp.int32) * S
             + second_cls_idx[1].astype(jnp.int32))                          # feature[i0, i1]

    # Batch tiling: one full tile for small B, otherwise lane-aligned tiles
    # (multiple of 128 keeps the per-tile output store unmasked / lane-dense
    # and keeps 2 * tile_b * D * itemsize well inside v7x's scoped VMEM).
    if B <= tile_b:
        tb = B
    else:
        tb = max(128, (tile_b // 128) * 128)
    b_pad = pl.cdiv(B, tb) * tb
    if b_pad != B:
        pad = b_pad - B
        rows1 = jnp.pad(rows1, (0, pad))   # padded rows gather row 0 (valid); sliced off below
        rows2 = jnp.pad(rows2, (0, pad))
    n_tiles = b_pad // tb

    kernel = functools.partial(_cosine_head_kernel, tile_b=tb, eps=float(cos_eps))

    grid_spec = pltpu.PrefetchScalarGridSpec(
        num_scalar_prefetch=2,                          # rows1, rows2 -> SMEM
        grid=(n_tiles,),
        in_specs=[pl.BlockSpec(memory_space=pl.ANY)],   # feature stays in HBM
        out_specs=pl.BlockSpec((1, tb), lambda i, r1, r2: (0, i)),
        scratch_shapes=[
            pltpu.VMEM((tb, D), feature.dtype),         # cls1 rows (input dtype)
            pltpu.VMEM((tb, D), feature.dtype),         # cls2 rows
            pltpu.SemaphoreType.DMA((2,)),
        ],
    )

    out = pl.pallas_call(
        kernel,
        out_shape=jax.ShapeDtypeStruct((1, b_pad), jnp.float32),
        grid_spec=grid_spec,
        compiler_params=pltpu.CompilerParams(
            dimension_semantics=("parallel",),          # megacore-shardable on v7x
        ),
    )(rows1, rows2, feat_flat)

    return out[0, :B]                                   # [B], matches torch's return shape


def init_params(key, input_dim, inner_dim):
    """Deterministic init of the (unused-in-forward) dense / out_proj params."""
    k1, k2 = jax.random.split(key, 2)
    params = {
        "dense": {
            "w": jax.random.normal(k1, (inner_dim, input_dim), jnp.float32) * 0.02,
            "b": jnp.zeros((inner_dim,), jnp.float32),
        },
        "out_proj": {
            "w": jax.random.normal(k2, (2, inner_dim), jnp.float32) * 0.02,
            "b": jnp.zeros((2,), jnp.float32),
        },
    }
    # TODO(synk): dense / out_proj / GELU / dropout are never used in forward()
    # of the reference module; kept only for structural fidelity.
    return params


if __name__ == "__main__":
    key = jax.random.PRNGKey(0)
    kf, ki, kp = jax.random.split(key, 3)

    B, S, D = 2, 8, 32          # batch, seq, hidden
    inner_dim = 16
    cos_eps = 1e-8

    _ = init_params(kp, input_dim=D, inner_dim=inner_dim)  # shapes per __init__ (unused in forward)

    feature = jax.random.normal(kf, (B, S, D), jnp.float32)
    # second CLS positions: (batch indices, sequence indices), one per example
    batch_idx = jnp.arange(B, dtype=jnp.int32)
    seq_idx = jax.random.randint(ki, (B,), 1, S).astype(jnp.int32)
    second_cls_idx = jnp.stack([batch_idx, seq_idx], axis=0)  # [2, B]

    out = two_sentence_regression_head(feature, second_cls_idx, cos_eps=cos_eps)
    out = jax.block_until_ready(out)

    # reference check in plain JAX
    cls1 = feature[:, 0, :]
    cls2 = feature[second_cls_idx[0], second_cls_idx[1]]
    num = jnp.sum(cls1 * cls2, axis=-1)
    den = jnp.maximum(
        jnp.linalg.norm(cls1, axis=-1) * jnp.linalg.norm(cls2, axis=-1), cos_eps
    )
    ref = num / den
    assert out.shape == (B,)
    assert jnp.allclose(out, ref, atol=1e-5), (out, ref)

    print("KERNEL_OK")
</pallas_src>

<mosaic_0001>
module attributes {stable_mosaic.version = 11 : i64} {
  func.func @_cosine_head_kernel(%arg0: i32, %arg1: memref<2xi32, #tpu.memory_space<smem>>, %arg2: memref<2xi32, #tpu.memory_space<smem>>, %arg3: memref<16x32xf32, #tpu.memory_space<any>>, %arg4: memref<1x2xf32, #tpu.memory_space<vmem>>, %arg5: memref<2x32xf32, #tpu.memory_space<vmem>>, %arg6: memref<2x32xf32, #tpu.memory_space<vmem>>, %arg7: memref<2x!tpu.dma_semaphore, #tpu.memory_space<semaphore_mem>>) attributes {dimension_semantics = [#tpu.dimension_semantics<parallel>], iteration_bounds = array<i64: 1>, scalar_prefetch = 2 : i64, scratch_operands = 3 : i64, tpu.core_type = #tpu.core_type<tc>, window_params = [{}, {transform_indices = @transform_1, window_bounds = array<i64: 1, 2>}]} {
    %c2_i32 = arith.constant 2 : i32
    %0 = arith.muli %arg0, %c2_i32 : i32
    %c0_i32 = arith.constant 0 : i32
    %c2_i32_0 = arith.constant 2 : i32
    %1 = arith.addi %c0_i32, %c2_i32_0 : i32
    %c1_i32 = arith.constant 1 : i32
    scf.for %arg8 = %c0_i32 to %1 step %c1_i32  : i32 {
      %c1_i32_14 = arith.constant 1 : i32
      %21 = arith.muli %arg8, %c1_i32_14 : i32
      %c0_i32_15 = arith.constant 0 : i32
      %22 = arith.addi %c0_i32_15, %21 : i32
      %23 = arith.addi %0, %22 : i32
      %24 = arith.index_cast %23 : i32 to index
      %25 = memref.load %arg1[%24] : memref<2xi32, #tpu.memory_space<smem>>
      %c0_i32_16 = arith.constant 0 : i32
      %c0_i32_17 = arith.constant 0 : i32
      %26 = tpu.memref_slice %arg3[%25, %c0_i32_17] : memref<16x32xf32, #tpu.memory_space<any>> -> memref<1x32xf32, #tpu.memory_space<any>>
      %27 = tpu.memref_squeeze %26 : memref<1x32xf32, #tpu.memory_space<any>> -> memref<32xf32, #tpu.memory_space<any>>
      %c0_i32_18 = arith.constant 0 : i32
      %28 = tpu.memref_slice %arg5[%22, %c0_i32_18] : memref<2x32xf32, #tpu.memory_space<vmem>> -> memref<1x32xf32, #tpu.memory_space<vmem>>
      %29 = tpu.memref_squeeze %28 : memref<1x32xf32, #tpu.memory_space<vmem>> -> memref<32xf32, #tpu.memory_space<vmem>>
      %30 = tpu.memref_slice %arg7[%c0_i32_16] : memref<2x!tpu.dma_semaphore, #tpu.memory_space<semaphore_mem>> -> memref<1x!tpu.dma_semaphore, #tpu.memory_space<semaphore_mem>>
      %31 = tpu.memref_squeeze %30 : memref<1x!tpu.dma_semaphore, #tpu.memory_space<semaphore_mem>> -> memref<!tpu.dma_semaphore, #tpu.memory_space<semaphore_mem>>
      tpu.enqueue_dma source(%27 : memref<32xf32, #tpu.memory_space<any>>) target(%29 : memref<32xf32, #tpu.memory_space<vmem>>) target_semaphore(%31 : memref<!tpu.dma_semaphore, #tpu.memory_space<semaphore_mem>>)
      %32 = arith.addi %0, %22 : i32
      %33 = arith.index_cast %32 : i32 to index
      %34 = memref.load %arg2[%33] : memref<2xi32, #tpu.memory_space<smem>>
      %c1_i32_19 = arith.constant 1 : i32
      %c0_i32_20 = arith.constant 0 : i32
      %35 = tpu.memref_slice %arg3[%34, %c0_i32_20] : memref<16x32xf32, #tpu.memory_space<any>> -> memref<1x32xf32, #tpu.memory_space<any>>
      %36 = tpu.memref_squeeze %35 : memref<1x32xf32, #tpu.memory_space<any>> -> memref<32xf32, #tpu.memory_space<any>>
      %c0_i32_21 = arith.constant 0 : i32
      %37 = tpu.memref_slice %arg6[%22, %c0_i32_21] : memref<2x32xf32, #tpu.memory_space<vmem>> -> memref<1x32xf32, #tpu.memory_space<vmem>>
      %38 = tpu.memref_squeeze %37 : memref<1x32xf32, #tpu.memory_space<vmem>> -> memref<32xf32, #tpu.memory_space<vmem>>
      %39 = tpu.memref_slice %arg7[%c1_i32_19] : memref<2x!tpu.dma_semaphore, #tpu.memory_space<semaphore_mem>> -> memref<1x!tpu.dma_semaphore, #tpu.memory_space<semaphore_mem>>
      %40 = tpu.memref_squeeze %39 : memref<1x!tpu.dma_semaphore, #tpu.memory_space<semaphore_mem>> -> memref<!tpu.dma_semaphore, #tpu.memory_space<semaphore_mem>>
      tpu.enqueue_dma source(%36 : memref<32xf32, #tpu.memory_space<any>>) target(%38 : memref<32xf32, #tpu.memory_space<vmem>>) target_semaphore(%40 : memref<!tpu.dma_semaphore, #tpu.memory_space<semaphore_mem>>)
    }
    %c2_i32_1 = arith.constant 2 : i32
    %c0_i32_2 = arith.constant 0 : i32
    %c2_i32_3 = arith.constant 2 : i32
    %2 = arith.addi %c0_i32_2, %c2_i32_3 : i32
    %c1_i32_4 = arith.constant 1 : i32
    scf.for %arg8 = %c0_i32_2 to %2 step %c1_i32_4  : i32 {
      %c1_i32_14 = arith.constant 1 : i32
      %21 = arith.muli %arg8, %c1_i32_14 : i32
      %c0_i32_15 = arith.constant 0 : i32
      %22 = arith.addi %c0_i32_15, %21 : i32
      %23 = arith.addi %0, %22 : i32
      %24 = arith.index_cast %23 : i32 to index
      %25 = memref.load %arg1[%24] : memref<2xi32, #tpu.memory_space<smem>>
      %c0_i32_16 = arith.constant 0 : i32
      %c0_i32_17 = arith.constant 0 : i32
      %26 = tpu.memref_slice %arg3[%25, %c0_i32_17] : memref<16x32xf32, #tpu.memory_space<any>> -> memref<1x32xf32, #tpu.memory_space<any>>
      %27 = tpu.memref_squeeze %26 : memref<1x32xf32, #tpu.memory_space<any>> -> memref<32xf32, #tpu.memory_space<any>>
      %c0_i32_18 = arith.constant 0 : i32
      %28 = tpu.memref_slice %arg5[%22, %c0_i32_18] : memref<2x32xf32, #tpu.memory_space<vmem>> -> memref<1x32xf32, #tpu.memory_space<vmem>>
      %29 = tpu.memref_squeeze %28 : memref<1x32xf32, #tpu.memory_space<vmem>> -> memref<32xf32, #tpu.memory_space<vmem>>
      %30 = tpu.memref_slice %arg7[%c0_i32_16] : memref<2x!tpu.dma_semaphore, #tpu.memory_space<semaphore_mem>> -> memref<1x!tpu.dma_semaphore, #tpu.memory_space<semaphore_mem>>
      %31 = tpu.memref_squeeze %30 : memref<1x!tpu.dma_semaphore, #tpu.memory_space<semaphore_mem>> -> memref<!tpu.dma_semaphore, #tpu.memory_space<semaphore_mem>>
      tpu.wait_dma2 semaphore(%31 : memref<!tpu.dma_semaphore, #tpu.memory_space<semaphore_mem>>) src(%27 : memref<32xf32, #tpu.memory_space<any>>) dst(%29 : memref<32xf32, #tpu.memory_space<vmem>>)
      %32 = arith.addi %0, %22 : i32
      %33 = arith.index_cast %32 : i32 to index
      %34 = memref.load %arg2[%33] : memref<2xi32, #tpu.memory_space<smem>>
      %c1_i32_19 = arith.constant 1 : i32
      %c0_i32_20 = arith.constant 0 : i32
      %35 = tpu.memref_slice %arg3[%34, %c0_i32_20] : memref<16x32xf32, #tpu.memory_space<any>> -> memref<1x32xf32, #tpu.memory_space<any>>
      %36 = tpu.memref_squeeze %35 : memref<1x32xf32, #tpu.memory_space<any>> -> memref<32xf32, #tpu.memory_space<any>>
      %c0_i32_21 = arith.constant 0 : i32
      %37 = tpu.memref_slice %arg6[%22, %c0_i32_21] : memref<2x32xf32, #tpu.memory_space<vmem>> -> memref<1x32xf32, #tpu.memory_space<vmem>>
      %38 = tpu.memref_squeeze %37 : memref<1x32xf32, #tpu.memory_space<vmem>> -> memref<32xf32, #tpu.memory_space<vmem>>
      %39 = tpu.memref_slice %arg7[%c1_i32_19] : memref<2x!tpu.dma_semaphore, #tpu.memory_space<semaphore_mem>> -> memref<1x!tpu.dma_semaphore, #tpu.memory_space<semaphore_mem>>
      %40 = tpu.memref_squeeze %39 : memref<1x!tpu.dma_semaphore, #tpu.memory_space<semaphore_mem>> -> memref<!tpu.dma_semaphore, #tpu.memory_space<semaphore_mem>>
      tpu.wait_dma2 semaphore(%40 : memref<!tpu.dma_semaphore, #tpu.memory_space<semaphore_mem>>) src(%36 : memref<32xf32, #tpu.memory_space<any>>) dst(%38 : memref<32xf32, #tpu.memory_space<vmem>>)
    }
    %c2_i32_5 = arith.constant 2 : i32
    %c0 = arith.constant 0 : index
    %c0_6 = arith.constant 0 : index
    %3 = vector.load %arg5[%c0, %c0_6] : memref<2x32xf32, #tpu.memory_space<vmem>>, vector<2x32xf32>
    %c0_7 = arith.constant 0 : index
    %c0_8 = arith.constant 0 : index
    %4 = vector.load %arg6[%c0_7, %c0_8] : memref<2x32xf32, #tpu.memory_space<vmem>>, vector<2x32xf32>
    %5 = arith.mulf %3, %4 : vector<2x32xf32>
    %cst = arith.constant dense<0.000000e+00> : vector<2xf32>
    %6 = vector.multi_reduction <add>, %5, %cst [1] : vector<2x32xf32> to vector<2xf32>
    %7 = vector.shape_cast %6 : vector<2xf32> to vector<2x1xf32>
    %8 = arith.mulf %3, %3 : vector<2x32xf32>
    %cst_9 = arith.constant dense<0.000000e+00> : vector<2xf32>
    %9 = vector.multi_reduction <add>, %8, %cst_9 [1] : vector<2x32xf32> to vector<2xf32>
    %10 = vector.shape_cast %9 : vector<2xf32> to vector<2x1xf32>
    %11 = arith.mulf %4, %4 : vector<2x32xf32>
    %cst_10 = arith.constant dense<0.000000e+00> : vector<2xf32>
    %12 = vector.multi_reduction <add>, %11, %cst_10 [1] : vector<2x32xf32> to vector<2xf32>
    %13 = vector.shape_cast %12 : vector<2xf32> to vector<2x1xf32>
    %14 = arith.mulf %10, %13 : vector<2x1xf32>
    %cst_11 = arith.constant 1.000000e-16 : f32
    %15 = vector.broadcast %cst_11 : f32 to vector<2x1xf32>
    %16 = arith.maximumf %14, %15 : vector<2x1xf32>
    %17 = math.rsqrt %16 : vector<2x1xf32>
    %18 = arith.mulf %7, %17 : vector<2x1xf32>
    %19 = vector.shape_cast %18 : vector<2x1xf32> to vector<1x2xf32>
    %c0_12 = arith.constant 0 : index
    %c0_13 = arith.constant 0 : index
    %20 = vector.load %arg4[%c0_12, %c0_13] : memref<1x2xf32, #tpu.memory_space<vmem>>, vector<1x2xf32>
    tpu.vector_store %arg4[%c0_12, %c0_13], %19 {strides = array<i32>} : memref<1x2xf32, #tpu.memory_space<vmem>>, vector<1x2xf32>,
    return
  }
  func.func @transform_1(%arg0: i32, %arg1: memref<2xi32, #tpu.memory_space<smem>>, %arg2: memref<2xi32, #tpu.memory_space<smem>>) -> (i32, i32) {
    %c0_i32 = arith.constant 0 : i32
    %c0_i32_0 = arith.constant 0 : i32
    return %c0_i32, %arg0 : i32, i32
  }
}

</mosaic_0001>

<bundles_post_ra>
// kernel: tpu_custom_call.1
= control target key start
LH: loop header
LB: loop body
LE: loop exit
PB: predicated region body
PF: predicated region fallthrough
CT: control target
= control target key end

     0   :  { %s275_s12 = smov [#allocation6]   ;;  %s345_s0 = inlined_call_operand.hbm [shape: s32[2], index: 0, kind: input, shape index: {}]   ;;  %s346_s2 = inlined_call_operand.hbm [shape: f32[16,32], index: 2, kind: input, shape index: {}]   ;;  %s347_s3 = inlined_call_operand.hbm [shape: f32[1,2], index: 3, kind: output, shape index: {}]   ;;  %s348_s1 = inlined_call_operand.vmem [shape: s32[2], index: 1, kind: input, shape index: {}]  }
   0x1   :  { %9 = dma.hbm_to_smem %s345_s0, 16, %s275_s12, [#allocation5] }
   0x2   :  { %s10_s17 = sshll.u32 %s348_s1, 4  ;;  %s11_s17 = int_to_ptr.vmem [resolvable:$true] %s10_s17 }
   0x3   :  { %s175_s18 = scalar_lea.vmem %s11_s17, 16  ;;  %p180_p1 = scmp.lt.s32.totalorder %s11_s17, %s11_s17 }
   0x4   :  { %p176_p0 = scmp.ne.s32.totalorder %s11_s17, %s175_s18  ;;  %p181_p2 = scmp.lt.s32.totalorder %s175_s18, %s175_s18 }
   0x6   :  { %p182_p3 = por %p181_p2, %p180_p1 }
   0x8   :  { %p183_p4 = pnand %p182_p3, %p176_p0 }
   0xa   :  { %186 = shalt.err (!%p183_p4)  }
   0xb   :  { %s276_s19 = smov [#allocation7]  }
   0xc   :  { %13 = dma.vmem_to_smem %s11_s17, 16, %s276_s19, [#allocation5] }
   0xd   :  { %259 = dma.done.wait [#allocation5], 32 }
   0xe   :  { %260 = vsyncadd [#allocation5], 4294967264 }
   0xf   :  { %15 = sfence }
  0x10   :  { %16 = vsyncpa [#allocation9], 0  ;;  %s306_s20 = smov 0  }
  0x11 LB: > { %s25_s0 = sld [smem:[#allocation6 + %s269_s20]]  ;;  %s28_s21 = scalar_lea.vmem [#allocation2], %s269_s20  ;;  %s269_s20 = sphi %s306_s20, %s23_s20  }
  0x12   : > { %s313_s1 = sld [smem:[#allocation7 + %s269_s20]]  ;;  %s36_s22 = sshll.u32 %s28_s21, 4  ;;  %s37_s22 = int_to_ptr.vmem [resolvable:$true] %s36_s22 }
  0x13   : > { %s43_s23 = scalar_lea.vmem [#allocation3], %s269_s20  ;;  %s189_s6 = scalar_lea.hbm %s346_s2, 256 }
  0x14   : > { %s52_s24 = sshll.u32 %s43_s23, 4  ;;  %s317_s24 = int_to_ptr.vmem [resolvable:$true] %s52_s24 }
  0x17   : > { %s142_s25 = sshll.u32 %s25_s0, 4 }
  0x18   : > { %s27_s28 = scalar_lea.hbm %s346_s2, %s142_s25  ;;  %s143_s29 = sshll.u32 %s313_s1, 4 }
  0x19   : > { %s187_s30 = scalar_lea.hbm %s27_s28, 16  ;;  %p190_p6 = scmp.lt.s32.totalorder %s27_s28, %s346_s2 }
  0x1a   : > { %p188_p5 = scmp.ne.s32.totalorder %s27_s28, %s187_s30  ;;  %p191_p7 = scmp.lt.s32.totalorder %s189_s6, %s187_s30 }
  0x1c   : > { %p192_p8 = por %p191_p7, %p190_p6 }
  0x1e   : > { %p193_p9 = pnand %p192_p8, %p188_p5 }
  0x20   : > { %196 = shalt.err (!%p193_p9)  }
  0x21   : > { %s197_s9 = scalar_lea.vmem %s37_s22, 16  ;;  %s277_s10 = smov [#allocation2]  }
  0x22   : > { %p198_p10 = scmp.ne.s32.totalorder %s37_s22, %s197_s9  ;;  %s199_s11 = sshll.u32 %s277_s10, 4  ;;  %s200_s11 = int_to_ptr.vmem [resolvable:$false] %s199_s11 }
  0x23   : > { %s201_s12 = scalar_lea.vmem %s200_s11, 32  ;;  %p202_p11 = scmp.lt.s32.totalorder %s37_s22, %s200_s11 }
  0x24   : > { %p203_p12 = scmp.lt.s32.totalorder %s201_s12, %s197_s9 }
  0x26   : > { %p204_p13 = por %p203_p12, %p202_p11 }
  0x28   : > { %p205_p0 = pnand %p204_p13, %p198_p10 }
  0x2a   : > { %208 = shalt.err (!%p205_p0)  }
  0x2b   : > { %39 = dma.hbm_to_vmem [thread:$0]  %s27_s28, 16, %s37_s22, [#allocation4] }
  0x2c   : > { %s42_s15 = scalar_lea.hbm %s346_s2, %s143_s29 }
  0x2d   : > { %s209_s16 = scalar_lea.hbm %s42_s15, 16  ;;  %p212_p2 = scmp.lt.s32.totalorder %s42_s15, %s346_s2 }
  0x2e   : > { %p210_p1 = scmp.ne.s32.totalorder %s42_s15, %s209_s16  ;;  %p213_p3 = scmp.lt.s32.totalorder %s189_s6, %s209_s16 }
  0x30   : > { %p214_p4 = por %p213_p3, %p212_p2 }
  0x32   : > { %p215_p5 = pnand %p214_p4, %p210_p1 }
  0x34   : > { %218 = shalt.err (!%p215_p5)  }
  0x35   : > { %s219_s19 = scalar_lea.vmem %s317_s24, 16  ;;  %s278_s0 = smov [#allocation3]  }
  0x36   : > { %p220_p6 = scmp.ne.s32.totalorder %s317_s24, %s219_s19  ;;  %s221_s1 = sshll.u32 %s278_s0, 4  ;;  %s222_s1 = int_to_ptr.vmem [resolvable:$false] %s221_s1 }
  0x37   : > { %s223_s21 = scalar_lea.vmem %s222_s1, 32  ;;  %p224_p7 = scmp.lt.s32.totalorder %s317_s24, %s222_s1 }
  0x38   : > { %p225_p8 = scmp.lt.s32.totalorder %s223_s21, %s219_s19 }
  0x3a   : > { %p226_p9 = por %p225_p8, %p224_p7 }
  0x3c   : > { %p227_p10 = pnand %p226_p9, %p220_p6 }
  0x3e   : > { %230 = shalt.err (!%p227_p10)  }
  0x3f   : > { %55 = dma.hbm_to_vmem [thread:$0]  %s42_s15, 16, %s317_s24, [#allocation4 + $0x1] }
  0x40   : > { %s23_s20 = sadd.s32 1, %s269_s20  }
  0x41   : > { %p20_p11 = scmp.ge.s32.totalorder %s23_s20, 2  }
  0x42   :  { %s271_s22 = smov (%p20_p11), 0  }
  0x43   :  { %22 = sbr.rel (!%p20_p11) target bundleno = 17 (0x11), region = 49 }
  0x48 LB: > { %261 = dma.done.wait [#allocation4], 16  ;;  %s273_s22 = sphi %s271_s22, %s61_s22  }
  0x49   : > { %262 = vsyncadd [#allocation4], 4294967280 }
  0x4a   : > { %263 = dma.done.wait [#allocation4 + $0x1], 16 }
  0x4b   : > { %264 = vsyncadd [#allocation4 + $0x1], 4294967280  ;;  %s61_s22 = sadd.s32 1, %s273_s22  }
  0x4c   : > { %p58_p12 = scmp.ge.s32.totalorder %s61_s22, 2  }
  0x4d   :  { %v70_v0 = vld [vmem:[#allocation2] sm:$0x3] (%p58_p12)  ;;  %vm73_vm0 = vcmask (%p58_p12), 254976   ;;  %v71_v1 = vld [vmem:[#allocation3] sm:$0x3] (%p58_p12)  ;;  %v90_v12 = vlaneseq (%p58_p12)  ;;  %s279_s2 = smov (%p58_p12), [#allocation8]  }
  0x4e   :  { %60 = sbr.rel (!%p58_p12) target bundleno = 72 (0x48), region = 60  ;;  %v77_v2 = vmul.f32 (%p58_p12), %v70_v0, %v70_v0  ;;  %v81_v3 = vmul.f32 (%p58_p12), %v71_v1, %v71_v1  ;;  %v72_v4 = vmul.f32 (%p58_p12), %v71_v1, %v70_v0  ;;  %s105_s20 = sshll.u32 (%p58_p12), %s279_s2, 4  ;;  %vm97_vm1 = vcmask (%p58_p12), 8192   ;;  %s106_s20 = int_to_ptr.vmem [resolvable:$true] %s105_s20 }
  0x4f   :  { %v91_v13 = vand.u32 (%p58_p12), 127, %v90_v12  ;;  %v93_v14 = vshrl.u32 (%p58_p12), %v90_v12, 7  ;;  %s231_s23 = scalar_lea.vmem (%p58_p12), %s106_s20, 16  ;;  %s235_s24 = scalar_lea.vmem (%p58_p12), %s106_s20, 32 }
  0x50   :  { %v78_v5 = vsel (%p58_p12), %vm73_vm0, %v77_v2, 0.0  ;;  %v74_v6 = vsel (%p58_p12), %vm73_vm0, %v72_v4, 0.0  ;;  %v82_v7 = vsel (%p58_p12), %vm73_vm0, %v81_v3, 0.0  ;;  %p232_p13 = scmp.ne.s32.totalorder (%p58_p12), %s106_s20, %s231_s23  ;;  %p236_p0 = scmp.lt.s32.totalorder (%p58_p12), %s106_s20, %s106_s20 }
  0x51   :  { %79 = vadd.xlane.f32.xlu0 (%p58_p12), %v78_v5  ;;  %75 = vadd.xlane.f32.xlu1 (%p58_p12), %v74_v6  ;;  %v94_v16 = vsub.s32 (%p58_p12), %v91_v13, %v93_v14  ;;  %p237_p1 = scmp.lt.s32.totalorder (%p58_p12), %s235_s24, %s231_s23 }
  0x53   :  { %p238_p2 = por %p237_p1, %p236_p0 }
  0x55   :  { %83 = vadd.xlane.f32.xlu0 %v82_v7  ;;  %p239_p3 = pnand %p238_p2, %p232_p13 }
  0xda   :  { %v80_v8 = vpop.xlane.xlu0 %79  ;;  %v76_v15 = vpop.xlane.xlu1 %75 }
  0xde   :  { %v84_v9 = vpop.xlane.xlu0 %83 }
  0xdf   :  { %v85_v10 = vmul.f32 %v84_v9, %v80_v8 }
  0xe1   :  { %v86_v11 = vmax.f32 %v85_v10, 1e-16 }
  0xe3   :  { %165 = vrsqrt.f32 %v86_v11 }
  0xf0   :  { %v166_v17 = vpop.eup %165 }
  0xf1   :  { %v88_v18 = vmul.f32 %v166_v17, %v76_v15 }
  0xf3   :  { %v95_v19 = vrot.slane %v88_v18, %v94_v16 }
  0xf5   :  { %98 = vst.msk [vmem:[#allocation8] sm:$0x1] %vm97_vm1, %v95_v19 }
  0xf6   :  { %242 = shalt.err (!%p239_p3)
}
  0xf7   :  { %108 = dma.vmem_to_hbm [thread:$0]  %s106_s20, 16, %s347_s3, [#allocation9]  }
  0xf8   :  { %265 = dma.done.wait [#allocation9], 16  }
  0xf9   :  { %266 = vsyncadd [#allocation9], 4294967280 }
  0xfa   :  { %112 = vsyncpa [#allocation9], 1 }
  0xfb   :  { %113 = vsyncmov [#allocation4] }
  0xfe   :  { %s114_s27 = vpop.sfrf %113 }
  0xff   :  { %p144_p4 = scmp.ne.s32.totalorder %s114_s27, 0 }
 0x101   :  { %118 = shalt.err (%p144_p4)  }
 0x102   :  { %120 = vsyncmov [#allocation4 + $0x1] }
 0x105   :  { %s121_s28 = vpop.sfrf %120 }
 0x106   :  { %p145_p5 = scmp.ne.s32.totalorder %s121_s28, 0 }
 0x108   :  { %125 = shalt.err (%p145_p5)  }

</bundles_post_ra>
